<compile_context>
chip_gen: v6e
topology: v6e:2x2x1
jax: 0.10.0
libtpu: 0.0.40
codegen_flags: <defaults>
</compile_context>

<pallas_src>
import jax
import jax.numpy as jnp
from jax.experimental import pallas as pl
from jax.experimental.pallas import tpu as pltpu


def _round_up(x, m):
    return (x + m - 1) // m * m


def _edge_length_partial_kernel(go_ref, gg_ref, out_ref):
    """go_ref / gg_ref: (9, TR, LANES) f32 blocks, plane index = 3*face_col + coord.

    Writes the per-lane partial sum of |d_out - d_gt| over the three triangle
    edges of this tile into out_ref (block shape (1, 1, LANES))."""
    eps = 1e-12

    def edge_sq(ref):
        # Per-coordinate squared edge lengths on the VPU (no XLU reduce).
        sq01 = sq02 = sq12 = None
        for c in range(3):                 # x, y, z live in separate planes
            e01 = ref[c] - ref[3 + c]      # v0 - v1
            e02 = ref[c] - ref[6 + c]      # v0 - v2
            e12 = e02 - e01                # v1 - v2 (reuse the two differences)
            if sq01 is None:
                sq01, sq02, sq12 = e01 * e01, e02 * e02, e12 * e12
            else:
                sq01 += e01 * e01
                sq02 += e02 * e02
                sq12 += e12 * e12
        return sq01, sq02, sq12

    o01, o02, o12 = edge_sq(go_ref)
    g01, g02, g12 = edge_sq(gg_ref)

    # Exactly one sqrt per edge per set (EUP slot), then VPU abs/add.
    diff = (jnp.abs(jnp.sqrt(o01 + eps) - jnp.sqrt(g01 + eps))
            + jnp.abs(jnp.sqrt(o02 + eps) - jnp.sqrt(g02 + eps))
            + jnp.abs(jnp.sqrt(o12 + eps) - jnp.sqrt(g12 + eps)))

    # Lane-dense partial sum: reduce only the sublane (row) axis here; the lane
    # axis and the grid axis are reduced in the wrapper.
    out_ref[...] = jnp.sum(diff, axis=0, keepdims=True)[None]


def _gather_planes(coord, face, n, n_pad, rows, lanes):
    """Gather coord[:, face[:, k], c] for all (k, c) into a (9, rows, lanes) f32
    array with a single XLA gather; plane index = 3*k + c; (batch, face)
    flattened with zero padding (padding contributes exactly 0 to the loss)."""
    coord = coord.astype(jnp.float32)
    B = coord.shape[0]
    F = face.shape[0]
    # One gather for all three face columns: (B, F*3, 3) -> (B, F, 3, 3)
    g = jnp.take(coord, face.reshape(-1), axis=1).reshape(B, F, 3, 3)
    # -> (face_col k, coord c, B, F) -> (9, B*F), batch-major like the reference.
    g = jnp.transpose(g, (2, 3, 0, 1)).reshape(9, B * F)
    g = jnp.pad(g, ((0, 0), (0, n_pad - n)))
    return g.reshape(9, rows, lanes)


def edge_length_loss(coord_out, coord_gt, face, *, lanes=512, rows_per_tile=128):
    """Pallas equivalent of EdgeLengthLoss.forward with mask=None."""
    # TODO(synk): mask branch ((loss*mask).sum()/(mask.sum()+1e-8)) not implemented;
    # only the default mask=None path (loss.mean()) is reproduced.
    # TODO(synk): the gather itself still runs as a fused XLA op in the wrapper
    # (lane-dense layout); a fully in-kernel gather needs Mosaic dynamic-gather.
    B, V, C = coord_out.shape
    F = face.shape[0]
    n = B * F

    # Lane-dense 2D tiling of the flattened (batch*face) axis.
    if n < 8 * lanes:
        lanes = 128
    rows_needed = pl.cdiv(n, lanes)
    rows_per_tile = min(rows_per_tile, _round_up(rows_needed, 8))
    rows = _round_up(rows_needed, rows_per_tile)
    n_pad = rows * lanes
    grid_r = rows // rows_per_tile

    go = _gather_planes(coord_out, face, n, n_pad, rows, lanes)
    gg = _gather_planes(coord_gt, face, n, n_pad, rows, lanes)

    partials = pl.pallas_call(
        _edge_length_partial_kernel,
        out_shape=jax.ShapeDtypeStruct((grid_r, 1, lanes), jnp.float32),
        grid=(grid_r,),
        in_specs=[
            pl.BlockSpec((9, rows_per_tile, lanes), lambda r: (0, r, 0)),
            pl.BlockSpec((9, rows_per_tile, lanes), lambda r: (0, r, 0)),
        ],
        out_specs=pl.BlockSpec((1, 1, lanes), lambda r: (r, 0, 0)),
        compiler_params=pltpu.CompilerParams(
            dimension_semantics=("parallel",)),
    )(go, gg)

    inv_count = 1.0 / float(B * 3 * F)
    return jnp.sum(partials) * inv_count


def _reference(coord_out, coord_gt, face):
    def dist(c, i, j):
        return jnp.sqrt(
            jnp.sum((c[:, face[:, i], :] - c[:, face[:, j], :]) ** 2, axis=2,
                    keepdims=True) + 1e-12)

    diff1 = jnp.abs(dist(coord_out, 0, 1) - dist(coord_gt, 0, 1))
    diff2 = jnp.abs(dist(coord_out, 0, 2) - dist(coord_gt, 0, 2))
    diff3 = jnp.abs(dist(coord_out, 1, 2) - dist(coord_gt, 1, 2))
    loss = jnp.concatenate((diff1, diff2, diff3), axis=1)
    return loss.mean()


def _make_faces(num_faces, num_verts):
    f0 = jnp.arange(num_faces, dtype=jnp.int32) % num_verts
    f1 = (jnp.arange(num_faces, dtype=jnp.int32) * 3 + 1) % num_verts
    f2 = (jnp.arange(num_faces, dtype=jnp.int32) * 5 + 2) % num_verts
    return jnp.stack([f0, f1, f2], axis=1)                # (num_faces, 3) int32


if __name__ == "__main__":
    key = jax.random.PRNGKey(0)
    k1, k2, k3, k4, k5, k6 = jax.random.split(key, 6)

    # Case 1: small shapes consistent with the module (batch=2, verts=16, xyz=3).
    B, V, C = 2, 16, 3
    NF = 8
    face = _make_faces(NF, V)
    coord_out = jax.random.normal(k1, (B, V, C), dtype=jnp.float32)
    coord_gt = jax.random.normal(k2, (B, V, C), dtype=jnp.float32)

    loss = jax.block_until_ready(edge_length_loss(coord_out, coord_gt, face))
    ref = jax.block_until_ready(_reference(coord_out, coord_gt, face))
    assert jnp.allclose(loss, ref, atol=1e-5, rtol=1e-5), (loss, ref)

    # Case 2: exercises multi-tile grid + zero-padding tail with small tiles.
    B2, V2, NF2 = 2, 64, 600
    face2 = _make_faces(NF2, V2)
    coord_out2 = jax.random.normal(k3, (B2, V2, C), dtype=jnp.float32)
    coord_gt2 = jax.random.normal(k4, (B2, V2, C), dtype=jnp.float32)

    loss2 = jax.block_until_ready(
        edge_length_loss(coord_out2, coord_gt2, face2, lanes=128, rows_per_tile=8))
    ref2 = jax.block_until_ready(_reference(coord_out2, coord_gt2, face2))
    assert jnp.allclose(loss2, ref2, atol=1e-5, rtol=1e-5), (loss2, ref2)

    # Case 3: default params -> exercises the 512-lane wide-tile path.
    B3, V3, NF3 = 2, 64, 2100
    face3 = _make_faces(NF3, V3)
    coord_out3 = jax.random.normal(k5, (B3, V3, C), dtype=jnp.float32)
    coord_gt3 = jax.random.normal(k6, (B3, V3, C), dtype=jnp.float32)

    loss3 = jax.block_until_ready(edge_length_loss(coord_out3, coord_gt3, face3))
    ref3 = jax.block_until_ready(_reference(coord_out3, coord_gt3, face3))
    assert jnp.allclose(loss3, ref3, atol=1e-5, rtol=1e-5), (loss3, ref3)

    print("KERNEL_OK")
</pallas_src>

<mosaic_0001>
module attributes {stable_mosaic.version = 11 : i64} {
  func.func @_edge_length_partial_kernel(%arg0: i32, %arg1: memref<9x8x128xf32, #tpu.memory_space<vmem>>, %arg2: memref<9x8x128xf32, #tpu.memory_space<vmem>>, %arg3: memref<1x1x128xf32, #tpu.memory_space<vmem>>) attributes {dimension_semantics = [#tpu.dimension_semantics<parallel>], iteration_bounds = array<i64: 1>, scalar_prefetch = 0 : i64, scratch_operands = 0 : i64, tpu.core_type = #tpu.core_type<tc>, window_params = [{transform_indices = @transform_0, window_bounds = array<i64: 9, 8, 128>}, {transform_indices = @transform_1, window_bounds = array<i64: 9, 8, 128>}, {transform_indices = @transform_2, window_bounds = array<i64: 1, 1, 128>}]} {
    %c0 = arith.constant 0 : index
    %c0_0 = arith.constant 0 : index
    %c0_1 = arith.constant 0 : index
    %0 = vector.load %arg1[%c0, %c0_0, %c0_1] : memref<9x8x128xf32, #tpu.memory_space<vmem>>, vector<1x8x128xf32>
    %1 = vector.shape_cast %0 : vector<1x8x128xf32> to vector<8x128xf32>
    %c3 = arith.constant 3 : index
    %c0_2 = arith.constant 0 : index
    %c0_3 = arith.constant 0 : index
    %2 = vector.load %arg1[%c3, %c0_2, %c0_3] : memref<9x8x128xf32, #tpu.memory_space<vmem>>, vector<1x8x128xf32>
    %3 = vector.shape_cast %2 : vector<1x8x128xf32> to vector<8x128xf32>
    %4 = arith.subf %1, %3 : vector<8x128xf32>
    %c0_4 = arith.constant 0 : index
    %c0_5 = arith.constant 0 : index
    %c0_6 = arith.constant 0 : index
    %5 = vector.load %arg1[%c0_4, %c0_5, %c0_6] : memref<9x8x128xf32, #tpu.memory_space<vmem>>, vector<1x8x128xf32>
    %6 = vector.shape_cast %5 : vector<1x8x128xf32> to vector<8x128xf32>
    %c6 = arith.constant 6 : index
    %c0_7 = arith.constant 0 : index
    %c0_8 = arith.constant 0 : index
    %7 = vector.load %arg1[%c6, %c0_7, %c0_8] : memref<9x8x128xf32, #tpu.memory_space<vmem>>, vector<1x8x128xf32>
    %8 = vector.shape_cast %7 : vector<1x8x128xf32> to vector<8x128xf32>
    %9 = arith.subf %6, %8 : vector<8x128xf32>
    %10 = arith.subf %9, %4 : vector<8x128xf32>
    %11 = arith.mulf %4, %4 : vector<8x128xf32>
    %12 = arith.mulf %9, %9 : vector<8x128xf32>
    %13 = arith.mulf %10, %10 : vector<8x128xf32>
    %c1 = arith.constant 1 : index
    %c0_9 = arith.constant 0 : index
    %c0_10 = arith.constant 0 : index
    %14 = vector.load %arg1[%c1, %c0_9, %c0_10] : memref<9x8x128xf32, #tpu.memory_space<vmem>>, vector<1x8x128xf32>
    %15 = vector.shape_cast %14 : vector<1x8x128xf32> to vector<8x128xf32>
    %c4 = arith.constant 4 : index
    %c0_11 = arith.constant 0 : index
    %c0_12 = arith.constant 0 : index
    %16 = vector.load %arg1[%c4, %c0_11, %c0_12] : memref<9x8x128xf32, #tpu.memory_space<vmem>>, vector<1x8x128xf32>
    %17 = vector.shape_cast %16 : vector<1x8x128xf32> to vector<8x128xf32>
    %18 = arith.subf %15, %17 : vector<8x128xf32>
    %c1_13 = arith.constant 1 : index
    %c0_14 = arith.constant 0 : index
    %c0_15 = arith.constant 0 : index
    %19 = vector.load %arg1[%c1_13, %c0_14, %c0_15] : memref<9x8x128xf32, #tpu.memory_space<vmem>>, vector<1x8x128xf32>
    %20 = vector.shape_cast %19 : vector<1x8x128xf32> to vector<8x128xf32>
    %c7 = arith.constant 7 : index
    %c0_16 = arith.constant 0 : index
    %c0_17 = arith.constant 0 : index
    %21 = vector.load %arg1[%c7, %c0_16, %c0_17] : memref<9x8x128xf32, #tpu.memory_space<vmem>>, vector<1x8x128xf32>
    %22 = vector.shape_cast %21 : vector<1x8x128xf32> to vector<8x128xf32>
    %23 = arith.subf %20, %22 : vector<8x128xf32>
    %24 = arith.subf %23, %18 : vector<8x128xf32>
    %25 = arith.mulf %18, %18 : vector<8x128xf32>
    %26 = arith.addf %11, %25 : vector<8x128xf32>
    %27 = arith.mulf %23, %23 : vector<8x128xf32>
    %28 = arith.addf %12, %27 : vector<8x128xf32>
    %29 = arith.mulf %24, %24 : vector<8x128xf32>
    %30 = arith.addf %13, %29 : vector<8x128xf32>
    %c2 = arith.constant 2 : index
    %c0_18 = arith.constant 0 : index
    %c0_19 = arith.constant 0 : index
    %31 = vector.load %arg1[%c2, %c0_18, %c0_19] : memref<9x8x128xf32, #tpu.memory_space<vmem>>, vector<1x8x128xf32>
    %32 = vector.shape_cast %31 : vector<1x8x128xf32> to vector<8x128xf32>
    %c5 = arith.constant 5 : index
    %c0_20 = arith.constant 0 : index
    %c0_21 = arith.constant 0 : index
    %33 = vector.load %arg1[%c5, %c0_20, %c0_21] : memref<9x8x128xf32, #tpu.memory_space<vmem>>, vector<1x8x128xf32>
    %34 = vector.shape_cast %33 : vector<1x8x128xf32> to vector<8x128xf32>
    %35 = arith.subf %32, %34 : vector<8x128xf32>
    %c2_22 = arith.constant 2 : index
    %c0_23 = arith.constant 0 : index
    %c0_24 = arith.constant 0 : index
    %36 = vector.load %arg1[%c2_22, %c0_23, %c0_24] : memref<9x8x128xf32, #tpu.memory_space<vmem>>, vector<1x8x128xf32>
    %37 = vector.shape_cast %36 : vector<1x8x128xf32> to vector<8x128xf32>
    %c8 = arith.constant 8 : index
    %c0_25 = arith.constant 0 : index
    %c0_26 = arith.constant 0 : index
    %38 = vector.load %arg1[%c8, %c0_25, %c0_26] : memref<9x8x128xf32, #tpu.memory_space<vmem>>, vector<1x8x128xf32>
    %39 = vector.shape_cast %38 : vector<1x8x128xf32> to vector<8x128xf32>
    %40 = arith.subf %37, %39 : vector<8x128xf32>
    %41 = arith.subf %40, %35 : vector<8x128xf32>
    %42 = arith.mulf %35, %35 : vector<8x128xf32>
    %43 = arith.addf %26, %42 : vector<8x128xf32>
    %44 = arith.mulf %40, %40 : vector<8x128xf32>
    %45 = arith.addf %28, %44 : vector<8x128xf32>
    %46 = arith.mulf %41, %41 : vector<8x128xf32>
    %47 = arith.addf %30, %46 : vector<8x128xf32>
    %c0_27 = arith.constant 0 : index
    %c0_28 = arith.constant 0 : index
    %c0_29 = arith.constant 0 : index
    %48 = vector.load %arg2[%c0_27, %c0_28, %c0_29] : memref<9x8x128xf32, #tpu.memory_space<vmem>>, vector<1x8x128xf32>
    %49 = vector.shape_cast %48 : vector<1x8x128xf32> to vector<8x128xf32>
    %c3_30 = arith.constant 3 : index
    %c0_31 = arith.constant 0 : index
    %c0_32 = arith.constant 0 : index
    %50 = vector.load %arg2[%c3_30, %c0_31, %c0_32] : memref<9x8x128xf32, #tpu.memory_space<vmem>>, vector<1x8x128xf32>
    %51 = vector.shape_cast %50 : vector<1x8x128xf32> to vector<8x128xf32>
    %52 = arith.subf %49, %51 : vector<8x128xf32>
    %c0_33 = arith.constant 0 : index
    %c0_34 = arith.constant 0 : index
    %c0_35 = arith.constant 0 : index
    %53 = vector.load %arg2[%c0_33, %c0_34, %c0_35] : memref<9x8x128xf32, #tpu.memory_space<vmem>>, vector<1x8x128xf32>
    %54 = vector.shape_cast %53 : vector<1x8x128xf32> to vector<8x128xf32>
    %c6_36 = arith.constant 6 : index
    %c0_37 = arith.constant 0 : index
    %c0_38 = arith.constant 0 : index
    %55 = vector.load %arg2[%c6_36, %c0_37, %c0_38] : memref<9x8x128xf32, #tpu.memory_space<vmem>>, vector<1x8x128xf32>
    %56 = vector.shape_cast %55 : vector<1x8x128xf32> to vector<8x128xf32>
    %57 = arith.subf %54, %56 : vector<8x128xf32>
    %58 = arith.subf %57, %52 : vector<8x128xf32>
    %59 = arith.mulf %52, %52 : vector<8x128xf32>
    %60 = arith.mulf %57, %57 : vector<8x128xf32>
    %61 = arith.mulf %58, %58 : vector<8x128xf32>
    %c1_39 = arith.constant 1 : index
    %c0_40 = arith.constant 0 : index
    %c0_41 = arith.constant 0 : index
    %62 = vector.load %arg2[%c1_39, %c0_40, %c0_41] : memref<9x8x128xf32, #tpu.memory_space<vmem>>, vector<1x8x128xf32>
    %63 = vector.shape_cast %62 : vector<1x8x128xf32> to vector<8x128xf32>
    %c4_42 = arith.constant 4 : index
    %c0_43 = arith.constant 0 : index
    %c0_44 = arith.constant 0 : index
    %64 = vector.load %arg2[%c4_42, %c0_43, %c0_44] : memref<9x8x128xf32, #tpu.memory_space<vmem>>, vector<1x8x128xf32>
    %65 = vector.shape_cast %64 : vector<1x8x128xf32> to vector<8x128xf32>
    %66 = arith.subf %63, %65 : vector<8x128xf32>
    %c1_45 = arith.constant 1 : index
    %c0_46 = arith.constant 0 : index
    %c0_47 = arith.constant 0 : index
    %67 = vector.load %arg2[%c1_45, %c0_46, %c0_47] : memref<9x8x128xf32, #tpu.memory_space<vmem>>, vector<1x8x128xf32>
    %68 = vector.shape_cast %67 : vector<1x8x128xf32> to vector<8x128xf32>
    %c7_48 = arith.constant 7 : index
    %c0_49 = arith.constant 0 : index
    %c0_50 = arith.constant 0 : index
    %69 = vector.load %arg2[%c7_48, %c0_49, %c0_50] : memref<9x8x128xf32, #tpu.memory_space<vmem>>, vector<1x8x128xf32>
    %70 = vector.shape_cast %69 : vector<1x8x128xf32> to vector<8x128xf32>
    %71 = arith.subf %68, %70 : vector<8x128xf32>
    %72 = arith.subf %71, %66 : vector<8x128xf32>
    %73 = arith.mulf %66, %66 : vector<8x128xf32>
    %74 = arith.addf %59, %73 : vector<8x128xf32>
    %75 = arith.mulf %71, %71 : vector<8x128xf32>
    %76 = arith.addf %60, %75 : vector<8x128xf32>
    %77 = arith.mulf %72, %72 : vector<8x128xf32>
    %78 = arith.addf %61, %77 : vector<8x128xf32>
    %c2_51 = arith.constant 2 : index
    %c0_52 = arith.constant 0 : index
    %c0_53 = arith.constant 0 : index
    %79 = vector.load %arg2[%c2_51, %c0_52, %c0_53] : memref<9x8x128xf32, #tpu.memory_space<vmem>>, vector<1x8x128xf32>
    %80 = vector.shape_cast %79 : vector<1x8x128xf32> to vector<8x128xf32>
    %c5_54 = arith.constant 5 : index
    %c0_55 = arith.constant 0 : index
    %c0_56 = arith.constant 0 : index
    %81 = vector.load %arg2[%c5_54, %c0_55, %c0_56] : memref<9x8x128xf32, #tpu.memory_space<vmem>>, vector<1x8x128xf32>
    %82 = vector.shape_cast %81 : vector<1x8x128xf32> to vector<8x128xf32>
    %83 = arith.subf %80, %82 : vector<8x128xf32>
    %c2_57 = arith.constant 2 : index
    %c0_58 = arith.constant 0 : index
    %c0_59 = arith.constant 0 : index
    %84 = vector.load %arg2[%c2_57, %c0_58, %c0_59] : memref<9x8x128xf32, #tpu.memory_space<vmem>>, vector<1x8x128xf32>
    %85 = vector.shape_cast %84 : vector<1x8x128xf32> to vector<8x128xf32>
    %c8_60 = arith.constant 8 : index
    %c0_61 = arith.constant 0 : index
    %c0_62 = arith.constant 0 : index
    %86 = vector.load %arg2[%c8_60, %c0_61, %c0_62] : memref<9x8x128xf32, #tpu.memory_space<vmem>>, vector<1x8x128xf32>
    %87 = vector.shape_cast %86 : vector<1x8x128xf32> to vector<8x128xf32>
    %88 = arith.subf %85, %87 : vector<8x128xf32>
    %89 = arith.subf %88, %83 : vector<8x128xf32>
    %90 = arith.mulf %83, %83 : vector<8x128xf32>
    %91 = arith.addf %74, %90 : vector<8x128xf32>
    %92 = arith.mulf %88, %88 : vector<8x128xf32>
    %93 = arith.addf %76, %92 : vector<8x128xf32>
    %94 = arith.mulf %89, %89 : vector<8x128xf32>
    %95 = arith.addf %78, %94 : vector<8x128xf32>
    %cst = arith.constant 9.99999996E-13 : f32
    %96 = vector.broadcast %cst : f32 to vector<8x128xf32>
    %97 = arith.addf %43, %96 : vector<8x128xf32>
    %98 = math.sqrt %97 : vector<8x128xf32>
    %cst_63 = arith.constant 9.99999996E-13 : f32
    %99 = vector.broadcast %cst_63 : f32 to vector<8x128xf32>
    %100 = arith.addf %91, %99 : vector<8x128xf32>
    %101 = math.sqrt %100 : vector<8x128xf32>
    %102 = arith.subf %98, %101 : vector<8x128xf32>
    %103 = math.absf %102 : vector<8x128xf32>
    %cst_64 = arith.constant 9.99999996E-13 : f32
    %104 = vector.broadcast %cst_64 : f32 to vector<8x128xf32>
    %105 = arith.addf %45, %104 : vector<8x128xf32>
    %106 = math.sqrt %105 : vector<8x128xf32>
    %cst_65 = arith.constant 9.99999996E-13 : f32
    %107 = vector.broadcast %cst_65 : f32 to vector<8x128xf32>
    %108 = arith.addf %93, %107 : vector<8x128xf32>
    %109 = math.sqrt %108 : vector<8x128xf32>
    %110 = arith.subf %106, %109 : vector<8x128xf32>
    %111 = math.absf %110 : vector<8x128xf32>
    %112 = arith.addf %103, %111 : vector<8x128xf32>
    %cst_66 = arith.constant 9.99999996E-13 : f32
    %113 = vector.broadcast %cst_66 : f32 to vector<8x128xf32>
    %114 = arith.addf %47, %113 : vector<8x128xf32>
    %115 = math.sqrt %114 : vector<8x128xf32>
    %cst_67 = arith.constant 9.99999996E-13 : f32
    %116 = vector.broadcast %cst_67 : f32 to vector<8x128xf32>
    %117 = arith.addf %95, %116 : vector<8x128xf32>
    %118 = math.sqrt %117 : vector<8x128xf32>
    %119 = arith.subf %115, %118 : vector<8x128xf32>
    %120 = math.absf %119 : vector<8x128xf32>
    %121 = arith.addf %112, %120 : vector<8x128xf32>
    %cst_68 = arith.constant dense<0.000000e+00> : vector<128xf32>
    %122 = vector.multi_reduction <add>, %121, %cst_68 [0] : vector<8x128xf32> to vector<128xf32>
    %123 = vector.shape_cast %122 : vector<128xf32> to vector<1x128xf32>
    %124 = vector.shape_cast %123 : vector<1x128xf32> to vector<1x1x128xf32>
    %c0_69 = arith.constant 0 : index
    %c0_70 = arith.constant 0 : index
    %c0_71 = arith.constant 0 : index
    %125 = vector.load %arg3[%c0_69, %c0_70, %c0_71] : memref<1x1x128xf32, #tpu.memory_space<vmem>>, vector<1x1x128xf32>
    tpu.vector_store %arg3[%c0_69, %c0_70, %c0_71], %124 {strides = array<i32>} : memref<1x1x128xf32, #tpu.memory_space<vmem>>, vector<1x1x128xf32>,
    return
  }
  func.func @transform_0(%arg0: i32) -> (i32, i32, i32) {
    %c0_i32 = arith.constant 0 : i32
    %c0_i32_0 = arith.constant 0 : i32
    %c0_i32_1 = arith.constant 0 : i32
    return %c0_i32, %arg0, %c0_i32_0 : i32, i32, i32
  }
  func.func @transform_1(%arg0: i32) -> (i32, i32, i32) {
    %c0_i32 = arith.constant 0 : i32
    %c0_i32_0 = arith.constant 0 : i32
    %c0_i32_1 = arith.constant 0 : i32
    return %c0_i32, %arg0, %c0_i32_0 : i32, i32, i32
  }
  func.func @transform_2(%arg0: i32) -> (i32, i32, i32) {
    %c0_i32 = arith.constant 0 : i32
    %c0_i32_0 = arith.constant 0 : i32
    %c0_i32_1 = arith.constant 0 : i32
    return %arg0, %c0_i32, %c0_i32_0 : i32, i32, i32
  }
}

</mosaic_0001>

<bundles_post_ra>
// kernel: tpu_custom_call.1
= control target key start
LH: loop header
LB: loop body
LE: loop exit
PB: predicated region body
PF: predicated region fallthrough
CT: control target
= control target key end

     0   :  { %7 = vsyncpa [#allocation3], 0  ;;  %s313_s0 = inlined_call_operand.hbm [shape: f32[9,8,128], index: 0, kind: input, shape index: {}]   ;;  %s314_s1 = inlined_call_operand.hbm [shape: f32[9,8,128], index: 1, kind: input, shape index: {}]   ;;  %s315_s2 = inlined_call_operand.hbm [shape: f32[1,1,128], index: 2, kind: output, shape index: {}]  }
   0x1   :  { %8 = vsyncpa [#allocation6], 0 }
   0x2   :  { %9 = vsyncpa [#allocation4], 0  ;;  %s284_s9 = smov [#allocation2]  }
   0x3   :  { %s15_s10 = sshll.u32 %s284_s9, 4  ;;  %s16_s10 = int_to_ptr.vmem [resolvable:$true] %s15_s10 }
   0x4   :  { %s226_s11 = scalar_lea.vmem %s16_s10, 1152  ;;  %p231_p1 = scmp.lt.s32.totalorder %s16_s10, %s16_s10 }
   0x5   :  { %p227_p0 = scmp.ne.s32.totalorder %s16_s10, %s226_s11  ;;  %p232_p2 = scmp.lt.s32.totalorder %s226_s11, %s226_s11 }
   0x7   :  { %p233_p3 = por %p232_p2, %p231_p1 }
   0x9   :  { %p234_p4 = pnand %p233_p3, %p227_p0 }
   0xb   :  { %237 = shalt.err (!%p234_p4)
}
   0xc   :  { %s285_s12 = smov 128   ;;  %s286_s13 = smov 8  }
   0xd   :  { %21 = dma.hbm_to_vmem [thread:$0]  %s313_s0, 1152, %s16_s10, [#allocation3], %s285_s12, %s285_s12, %s286_s13  }
   0xe   :  { %s287_s16 = smov [#allocation5]  }
   0xf   :  { %s27_s17 = sshll.u32 %s287_s16, 4  ;;  %s28_s17 = int_to_ptr.vmem [resolvable:$true] %s27_s17 }
  0x10   :  { %s246_s18 = scalar_lea.vmem %s28_s17, 1152  ;;  %p251_p6 = scmp.lt.s32.totalorder %s28_s17, %s28_s17 }
  0x11   :  { %p247_p5 = scmp.ne.s32.totalorder %s28_s17, %s246_s18  ;;  %p252_p7 = scmp.lt.s32.totalorder %s246_s18, %s246_s18 }
  0x13   :  { %p253_p8 = por %p252_p7, %p251_p6 }
  0x15   :  { %p254_p9 = pnand %p253_p8, %p247_p5 }
  0x17   :  { %257 = shalt.err (!%p254_p9)
}
  0x18   :  { %33 = dma.hbm_to_vmem [thread:$0]  %s314_s1, 1152, %s28_s17, [#allocation6], %s285_s12, %s285_s12, %s286_s13  }
  0x19   :  { %278 = dma.done.wait [#allocation3], 1152  }
  0x1a   :  { %279 = vsyncadd [#allocation3], 4294966144 }
  0x1b   :  { %280 = dma.done.wait [#allocation6], 1152  }
  0x1c   :  { %281 = vsyncadd [#allocation6], 4294966144  ;;  %v40_v0 = vld [vmem:[#allocation2] sm:$0xff]  ;;  %v42_v1 = vld [vmem:[#allocation2 + $0x18] sm:$0xff]  ;;  %s288_s0 = smov [#allocation7]  }
  0x1d   :  { %v45_v2 = vld [vmem:[#allocation2 + $0x30] sm:$0xff]  ;;  %v43_v3 = vsub.f32 %v40_v0, %v42_v1  ;;  %v52_v5 = vld [vmem:[#allocation2 + $0x8] sm:$0xff]  ;;  %v54_v6 = vld [vmem:[#allocation2 + $0x20] sm:$0xff]  ;;  %s191_s1 = sshll.u32 %s288_s0, 4  ;;  %s192_s1 = int_to_ptr.vmem [resolvable:$true] %s191_s1 }
  0x1e   :  { %v46_v4 = vsub.f32 %v40_v0, %v45_v2  ;;  %v57_v7 = vld [vmem:[#allocation2 + $0x38] sm:$0xff]  ;;  %v55_v8 = vsub.f32 %v52_v5, %v54_v6  ;;  %v67_v10 = vld [vmem:[#allocation2 + $0x10] sm:$0xff]  ;;  %v69_v11 = vld [vmem:[#allocation2 + $0x28] sm:$0xff]  ;;  %s258_s21 = scalar_lea.vmem %s192_s1, 16  ;;  %s262_s22 = scalar_lea.vmem %s192_s1, 32 }
  0x1f   :  { %v58_v9 = vsub.f32 %v52_v5, %v57_v7  ;;  %v72_v12 = vld [vmem:[#allocation2 + $0x40] sm:$0xff]  ;;  %v48_v14 = vmul.f32 %v43_v3, %v43_v3  ;;  %v70_v16 = vsub.f32 %v67_v10, %v69_v11  ;;  %v81_v17 = vld [vmem:[#allocation5] sm:$0xff]  ;;  %v86_v19 = vld [vmem:[#allocation5 + $0x30] sm:$0xff]  ;;  %p259_p10 = scmp.ne.s32.totalorder %s192_s1, %s258_s21  ;;  %p263_p11 = scmp.lt.s32.totalorder %s192_s1, %s192_s1 }
  0x20   :  { %v47_v13 = vsub.f32 %v46_v4, %v43_v3  ;;  %v49_v15 = vmul.f32 %v46_v4, %v46_v4  ;;  %v83_v18 = vld [vmem:[#allocation5 + $0x18] sm:$0xff]  ;;  %v60_v21 = vmul.f32 %v55_v8, %v55_v8  ;;  %v73_v23 = vsub.f32 %v67_v10, %v72_v12  ;;  %v93_v28 = vld [vmem:[#allocation5 + $0x8] sm:$0xff]  ;;  %v95_v29 = vld [vmem:[#allocation5 + $0x20] sm:$0xff]  ;;  %p264_p12 = scmp.lt.s32.totalorder %s262_s22, %s258_s21 }
  0x21   :  { %v59_v20 = vsub.f32 %v58_v9, %v55_v8  ;;  %v62_v22 = vmul.f32 %v58_v9, %v58_v9  ;;  %v75_v25 = vmul.f32 %v70_v16, %v70_v16  ;;  %v84_v26 = vsub.f32 %v81_v17, %v83_v18  ;;  %v98_v34 = vld [vmem:[#allocation5 + $0x38] sm:$0xff]  ;;  %v108_v35 = vld [vmem:[#allocation5 + $0x10] sm:$0xff]  ;;  %v110_v36 = vld [vmem:[#allocation5 + $0x28] sm:$0xff] }
  0x22   :  { %v50_v24 = vmul.f32 %v47_v13, %v47_v13  ;;  %v87_v27 = vsub.f32 %v81_v17, %v86_v19  ;;  %v61_v30 = vadd.f32 %v60_v21, %v48_v14  ;;  %v74_v33 = vsub.f32 %v73_v23, %v70_v16  ;;  %v113_v41 = vld [vmem:[#allocation5 + $0x40] sm:$0xff]  ;;  %p265_p13 = por %p264_p12, %p263_p11 }
  0x23   :  { %v63_v31 = vadd.f32 %v62_v22, %v49_v15  ;;  %v64_v32 = vmul.f32 %v59_v20, %v59_v20  ;;  %v77_v37 = vmul.f32 %v73_v23, %v73_v23  ;;  %v89_v39 = vmul.f32 %v84_v26, %v84_v26 }
  0x24   :  { %v88_v38 = vsub.f32 %v87_v27, %v84_v26  ;;  %v90_v40 = vmul.f32 %v87_v27, %v87_v27  ;;  %v76_v43 = vadd.f32 %v75_v25, %v61_v30  ;;  %v79_v44 = vmul.f32 %v74_v33, %v74_v33  ;;  %p266_p0 = pnand %p265_p13, %p259_p10 }
  0x25   :  { %v65_v42 = vadd.f32 %v64_v32, %v50_v24  ;;  %v96_v45 = vsub.f32 %v93_v28, %v95_v29  ;;  %v78_v46 = vadd.f32 %v77_v37, %v63_v31  ;;  %v99_v48 = vsub.f32 %v93_v28, %v98_v34 }
  0x26   :  { %v91_v47 = vmul.f32 %v88_v38, %v88_v38  ;;  %v111_v49 = vsub.f32 %v108_v35, %v110_v36  ;;  %v114_v52 = vsub.f32 %v108_v35, %v113_v41  ;;  %v122_v53 = vadd.f32 1e-12, %v76_v43 }
  0x27   :  { %v80_v50 = vadd.f32 %v79_v44, %v65_v42  ;;  %v101_v51 = vmul.f32 %v96_v45, %v96_v45  ;;  %v100_v54 = vsub.f32 %v99_v48, %v96_v45  ;;  %v103_v55 = vmul.f32 %v99_v48, %v99_v48 }
  0x28   :  { %v116_v56 = vmul.f32 %v111_v49, %v111_v49  ;;  %v140_v57 = vadd.f32 1e-12, %v78_v46  ;;  %v115_v59 = vsub.f32 %v114_v52, %v111_v49  ;;  %v118_v60 = vmul.f32 %v114_v52, %v114_v52 }
  0x29   :  { %v102_v58 = vadd.f32 %v101_v51, %v89_v39  ;;  %206 = vrsqrt.f32 %v122_v53  ;;  %v104_v61 = vadd.f32 %v103_v55, %v90_v40  ;;  %v105_v62 = vmul.f32 %v100_v54, %v100_v54 }
  0x2a   :  { %v120_v0 = vmul.f32 %v115_v59, %v115_v59  ;;  %208 = vrsqrt.f32 %v140_v57  ;;  %v159_v4 = vadd.f32 1e-12, %v80_v50  ;;  %vm125_vm0 = vcmp.eq.f32.partialorder %v122_v53, inf }
  0x2b   :  { %v117_v63 = vadd.f32 %v116_v56, %v102_v58  ;;  %v106_v1 = vadd.f32 %v105_v62, %v91_v47  ;;  %v119_v2 = vadd.f32 %v118_v60, %v104_v61  ;;  %vm143_vm1 = vcmp.eq.f32.partialorder %v140_v57, inf }
  0x2c   :  { %v128_v12 = vand.u32 2147483648, %v122_v53  ;;  %vm127_vm2 = vcmp.eq.f32.partialorder %v122_v53, 0.0  ;;  %v146_v14 = vand.u32 2147483648, %v140_v57  ;;  %vm145_vm4 = vcmp.eq.f32.partialorder %v140_v57, 0.0 }
  0x2d   :  { %v130_v3 = vadd.f32 1e-12, %v117_v63  ;;  %v121_v5 = vadd.f32 %v120_v0, %v106_v1  ;;  %v148_v6 = vadd.f32 1e-12, %v119_v2  ;;  %vm162_vm8 = vcmp.eq.f32.partialorder %v159_v4, inf }
  0x2e   :  { %v165_v27 = vand.u32 2147483648, %v159_v4  ;;  %vm164_vm9 = vcmp.eq.f32.partialorder %v159_v4, 0.0 }
  0x2f   :  { %210 = vrsqrt.f32 %v130_v3  ;;  %v167_v7 = vadd.f32 1e-12, %v121_v5  ;;  %vm133_vm3 = vcmp.eq.f32.partialorder %v130_v3, inf  ;;  %v136_v16 = vand.u32 2147483648, %v130_v3 }
  0x30   :  { %212 = vrsqrt.f32 %v148_v6  ;;  %vm135_vm5 = vcmp.eq.f32.partialorder %v130_v3, 0.0  ;;  %vm151_vm6 = vcmp.eq.f32.partialorder %v148_v6, inf  ;;  %v154_v20 = vand.u32 2147483648, %v148_v6 }
  0x31   :  { %214 = vrsqrt.f32 %v159_v4  ;;  %vm153_vm7 = vcmp.eq.f32.partialorder %v148_v6, 0.0  ;;  %vm170_vm10 = vcmp.eq.f32.partialorder %v167_v7, inf  ;;  %v173_v34 = vand.u32 2147483648, %v167_v7 }
  0x32   :  { %216 = vrsqrt.f32 %v167_v7  ;;  %vm172_vm11 = vcmp.eq.f32.partialorder %v167_v7, 0.0 }
  0x36   :  { %v207_v8 = vpop.eup %206 }
  0x37   :  { %v124_v9 = vmul.f32 %v207_v8, %v122_v53  ;;  %v209_v10 = vpop.eup %208 }
  0x38   :  { %v142_v11 = vmul.f32 %v209_v10, %v140_v57 }
  0x39   :  { %v126_v13 = vsel %vm125_vm0, %v122_v53, %v124_v9 }
  0x3a   :  { %v144_v17 = vsel %vm143_vm1, %v140_v57, %v142_v11  ;;  %v129_v22 = vsel %vm127_vm2, %v128_v12, %v126_v13 }
  0x3b   :  { %v147_v25 = vsel %vm145_vm4, %v146_v14, %v144_v17 }
  0x3c   :  { %v211_v15 = vpop.eup %210 }
  0x3d   :  { %v213_v18 = vpop.eup %212  ;;  %v132_v19 = vmul.f32 %v211_v15, %v130_v3 }
  0x3e   :  { %v215_v21 = vpop.eup %214  ;;  %v150_v23 = vmul.f32 %v213_v18, %v148_v6 }
  0x3f   :  { %v134_v24 = vsel %vm133_vm3, %v130_v3, %v132_v19  ;;  %v161_v26 = vmul.f32 %v215_v21, %v159_v4  ;;  %v217_v30 = vpop.eup %216 }
  0x40   :  { %v137_v28 = vsel %vm135_vm5, %v136_v16, %v134_v24  ;;  %v152_v29 = vsel %vm151_vm6, %v148_v6, %v150_v23  ;;  %v169_v36 = vmul.f32 %v217_v30, %v167_v7 }
  0x41   :  { %v138_v31 = vsub.f32 %v129_v22, %v137_v28  ;;  %v155_v32 = vsel %vm153_vm7, %v154_v20, %v152_v29  ;;  %v163_v33 = vsel %vm162_vm8, %v159_v4, %v161_v26 }
  0x42   :  { %v156_v35 = vsub.f32 %v147_v25, %v155_v32  ;;  %v166_v38 = vsel %vm164_vm9, %v165_v27, %v163_v33  ;;  %v171_v40 = vsel %vm170_vm10, %v167_v7, %v169_v36 }
  0x43   :  { %v139_v37 = vand.u32 2147483647, %v138_v31  ;;  %v174_v41 = vsel %vm172_vm11, %v173_v34, %v171_v40 }
  0x44   :  { %v157_v39 = vand.u32 2147483647, %v156_v35  ;;  %v175_v43 = vsub.f32 %v166_v38, %v174_v41 }
  0x46   :  { %v158_v42 = vadd.f32 %v157_v39, %v139_v37  ;;  %v176_v44 = vand.u32 2147483647, %v175_v43 }
  0x48   :  { %v177_v45 = vadd.f32 %v176_v44, %v158_v42 }
  0x4a   :  { %v178_v46 = vrot.slane %v177_v45, 4 }
  0x4c   :  { %v179_v47 = vadd.f32 %v178_v46, %v177_v45 }
  0x4e   :  { %v180_v48 = vrot.slane %v179_v47, 2 }
  0x50   :  { %v181_v49 = vadd.f32 %v180_v48, %v179_v47 }
  0x52   :  { %v182_v50 = vrot.slane %v181_v49, 1 }
  0x54   :  { %v183_v51 = vadd.f32 %v182_v50, %v181_v49 }
  0x56   :  { %184 = vst [vmem:[#allocation7] sm:$0x1] %v183_v51 }
  0x57   :  { %269 = shalt.err (!%p266_p0)
}
  0x58   :  { %194 = dma.vmem_to_hbm [thread:$0]  %s192_s1, 16, %s315_s2, [#allocation4]  }
  0x59   :  { %282 = dma.done.wait [#allocation4], 16  }
  0x5a   :  { %283 = vsyncadd [#allocation4], 4294967280 }
  0x5b   :  { %198 = vsyncpa [#allocation3], 1 }
  0x5c   :  { %199 = vsyncpa [#allocation6], 1 }
  0x5d   :  { %200 = vsyncpa [#allocation4], 1 }

</bundles_post_ra>
